<compile_context>
chip_gen: v6e
topology: v6e:2x2x1
jax: 0.10.0
libtpu: 0.0.40
codegen_flags: <defaults>
</compile_context>

<pallas_src>
import jax
import jax.numpy as jnp
from jax.experimental import pallas as pl
from jax.experimental.pallas import tpu as pltpu


def _round_up(n, m):
    return ((n + m - 1) // m) * m


# ----------------------------------------------------------------------------
# Kernel: one batch tile per grid step; all weights VMEM-resident.
# ----------------------------------------------------------------------------
def _dueling_dqn_kernel(
    x_ref,                      # [TB, D_in]  f32
    w1_ref, b1_ref,             # [D_in, 96] bf16, [1, 96]  (layer1_task | layer1_1vm, BN-folded)
    wvm2_ref, bvm2_ref,         # [96, 32]  bf16 (rows 0..31 zero), [1, 32]  (layer1_2vm)
    w2a_ref, w2b_ref, b2_ref,   # [96, 32] bf16 (rows 32..95 zero), [32, 32] bf16, [1, 32]  (layer2)
    wh_ref, bh_ref,             # [32, 128] bf16 (dueling combine folded, lane-padded), [1, 128] f32
    out_ref,                    # [TB, 128] f32 (lane-dense; wrapper slices [:, :A])
):
    def lrelu(z):
        return jnp.maximum(z, 0.01 * z)          # LeakyReLU(0.01), one vmax

    x = x_ref[...].astype(w1_ref.dtype)

    # --- layer1_task + layer1_1vm fused into one K=D_in matmul ---------------
    z1 = jnp.dot(x, w1_ref[...], preferred_element_type=jnp.float32)
    # bias add + LeakyReLU in the epilogue dtype (bf16 on v6e/v7x)
    h1 = lrelu(z1.astype(b1_ref.dtype) + b1_ref[...]).astype(wvm2_ref.dtype)   # [TB, 96]

    # --- layer1_2vm: weight zero-padded to [96, 32] -> no lane slicing -------
    z2 = jnp.dot(h1, wvm2_ref[...], preferred_element_type=jnp.float32)
    x2 = lrelu(z2.astype(bvm2_ref.dtype) + bvm2_ref[...]).astype(w2b_ref.dtype)  # [TB, 32]

    # --- layer2 on concat(x1, x2): split-matmul-sum (no lane concat) ---------
    z3 = (jnp.dot(h1, w2a_ref[...], preferred_element_type=jnp.float32)
          + jnp.dot(x2, w2b_ref[...], preferred_element_type=jnp.float32))
    h2 = lrelu(z3.astype(b2_ref.dtype) + b2_ref[...]).astype(wh_ref.dtype)       # [TB, 32]

    # --- head: dueling combine is folded into wh/bh; f32, lane-dense store ---
    out_ref[...] = (jnp.dot(h2, wh_ref[...], preferred_element_type=jnp.float32)
                    + bh_ref[...])


# ----------------------------------------------------------------------------
# Wrapper: batch-tiled pallas_call.
# ----------------------------------------------------------------------------
def dueling_dqn_forward(x, fused, a_dim, *, block_batch=1024, core_parallel=False):
    """core_parallel=True targets v7x (2 TCs/chip): uses pltpu.CORE_PARALLEL and
    caps the tile at ~B/2 so both cores get grid steps.  Default keeps the
    portable "parallel" semantics (safe on v5e/v6e)."""
    B, d_in = x.shape
    n_out = fused["wh"].shape[1]                 # lane-padded head width (>= 128)

    # Batch tile: never exceeds B (keeps block shapes legal for any B).
    tb = min(block_batch, B)
    if core_parallel and B >= 32:
        tb = min(tb, _round_up(pl.cdiv(B, 2), 16))
    grid = (pl.cdiv(B, tb),)

    def batch_spec(n):
        return pl.BlockSpec((tb, n), lambda i: (i, 0))

    def resident_spec(arr):
        # Same block every step -> weights stay VMEM-resident across the grid.
        return pl.BlockSpec(arr.shape, lambda i: (0, 0))

    args = (x, fused["w1"], fused["b1"], fused["wvm2"], fused["bvm2"],
            fused["w2a"], fused["w2b"], fused["b2"], fused["wh"], fused["bh"])

    in_specs = [batch_spec(d_in)] + [resident_spec(a) for a in args[1:]]

    out_padded = pl.pallas_call(
        _dueling_dqn_kernel,
        out_shape=jax.ShapeDtypeStruct((B, n_out), jnp.float32),
        grid=grid,
        in_specs=in_specs,
        out_specs=batch_spec(n_out),
        compiler_params=pltpu.CompilerParams(
            dimension_semantics=((pltpu.CORE_PARALLEL,) if core_parallel
                                 else ("parallel",)),
            vmem_limit_bytes=32 * 1024 * 1024,   # footprint is far below this
        ),
    )(*args)

    # NOTE(v5e): if the 128-wide f32 writeback is too heavy there, emit the slab
    # in bf16 or keep the narrow A-wide output and re-measure.
    return out_padded[:, :a_dim]


# ----------------------------------------------------------------------------
# Deterministic raw (PyTorch-like) parameters: Linear + BN(eval) per layer.
# ----------------------------------------------------------------------------
def make_raw_params(key, s_task_dim, s_vm_dim, a_dim):
    keys = iter(jax.random.split(key, 32))

    def linear(fan_in, fan_out):
        w = jax.random.normal(next(keys), (fan_in, fan_out), jnp.float32) * 0.1
        b = jax.random.normal(next(keys), (fan_out,), jnp.float32) * 0.05
        return w, b

    def bn(n):
        gamma = 1.0 + 0.1 * jax.random.normal(next(keys), (n,), jnp.float32)
        beta = 0.05 * jax.random.normal(next(keys), (n,), jnp.float32)
        mean = 0.1 * jax.random.normal(next(keys), (n,), jnp.float32)
        var = 1.0 + 0.1 * jnp.abs(jax.random.normal(next(keys), (n,), jnp.float32))
        return gamma, beta, mean, var

    raw = {}
    wt, bt = linear(s_task_dim, 32)
    raw["layer1_task"] = (wt, bt) + bn(32)
    wv1, bv1 = linear(s_vm_dim, 64)
    raw["layer1_1vm"] = (wv1, bv1) + bn(64)
    wv2, bv2 = linear(64, 32)
    raw["layer1_2vm"] = (wv2, bv2) + bn(32)
    w2, b2 = linear(64, 32)
    raw["layer2"] = (w2, b2) + bn(32)
    raw["wa"], raw["ba"] = linear(32, a_dim)
    raw["wv"], raw["bv"] = linear(32, 1)
    return raw


# ----------------------------------------------------------------------------
# Offline fusion: fold BN into weights, fold the dueling combine into the head,
# pad/fuse blocks, cast matmul weights (and epilogue biases) once.
# ----------------------------------------------------------------------------
def prepare_fused_params(raw, s_task_dim, s_vm_dim, a_dim, *,
                         matmul_dtype=jnp.bfloat16,
                         epilogue_dtype=jnp.bfloat16,   # use jnp.float32 on v5e
                         out_lanes=128, eps=1e-5):
    def fold(w, b, gamma, beta, mean, var):
        scale = gamma / jnp.sqrt(var + eps)
        return w * scale[None, :], (beta + (b - mean) * scale)[None, :]

    wt, sht = fold(*raw["layer1_task"])
    wv1, shv1 = fold(*raw["layer1_1vm"])
    wv2, shv2 = fold(*raw["layer1_2vm"])
    w2, sh2 = fold(*raw["layer2"])

    d_in = s_task_dim + s_vm_dim
    w1 = jnp.zeros((d_in, 96), jnp.float32)
    w1 = w1.at[:s_task_dim, :32].set(wt).at[s_task_dim:, 32:].set(wv1)
    b1 = jnp.concatenate([sht, shv1], axis=1)                          # [1, 96]

    wvm2 = jnp.zeros((96, 32), jnp.float32).at[32:, :].set(wv2)        # [96, 32]
    w2a = jnp.zeros((96, 32), jnp.float32).at[:32, :].set(w2[:32])     # [96, 32]
    w2b = w2[32:]                                                      # [32, 32]

    # Dueling combine (linear) folded into the head:
    #   out = h @ (wa + wv - mean_cols(wa)) + (ba + bv - mean(ba))
    wa, ba = raw["wa"], raw["ba"]
    wv, bv = raw["wv"], raw["bv"]
    wh = wa + wv - jnp.mean(wa, axis=1, keepdims=True)                 # [32, A]
    bh = ba + bv[0] - jnp.mean(ba)                                     # [A]

    # Lane-pad the head to a 128-multiple so the output store is unmasked.
    n_out = max(out_lanes, _round_up(a_dim, out_lanes))
    wh_pad = jnp.zeros((32, n_out), jnp.float32).at[:, :a_dim].set(wh)
    bh_pad = jnp.zeros((1, n_out), jnp.float32).at[0, :a_dim].set(bh)

    cast_w = lambda w: w.astype(matmul_dtype)
    cast_b = lambda b: b.astype(epilogue_dtype)
    return {"w1": cast_w(w1), "b1": cast_b(b1),
            "wvm2": cast_w(wvm2), "bvm2": cast_b(shv2),
            "w2a": cast_w(w2a), "w2b": cast_w(w2b), "b2": cast_b(sh2),
            "wh": cast_w(wh_pad), "bh": bh_pad}       # bh stays f32 (final math f32)


# ----------------------------------------------------------------------------
# Pure-JAX f32 reference built from the RAW params (eval-mode PyTorch math).
# ----------------------------------------------------------------------------
def reference_forward(x, raw, s_task_dim, eps=1e-5):
    def lrelu(v):
        return jnp.where(v > 0, v, 0.01 * v)

    def lin_bn(h, w, b, gamma, beta, mean, var):
        z = h @ w + b
        return (z - mean) / jnp.sqrt(var + eps) * gamma + beta

    x1 = lrelu(lin_bn(x[:, :s_task_dim], *raw["layer1_task"]))
    x2 = lrelu(lin_bn(x[:, s_task_dim:], *raw["layer1_1vm"]))
    x2 = lrelu(lin_bn(x2, *raw["layer1_2vm"]))
    cat = jnp.concatenate([x1, x2], axis=1)
    h = lrelu(lin_bn(cat, *raw["layer2"]))
    adv = h @ raw["wa"] + raw["ba"]
    val = h @ raw["wv"] + raw["bv"]
    return adv + val - jnp.mean(adv, axis=1, keepdims=True)


if __name__ == "__main__":
    # Small, deterministic check: batch=64 split into two grid steps (tb=32).
    S_TASK_DIM, S_VM_DIM, A_DIM = 8, 24, 10
    BATCH = 64

    key = jax.random.PRNGKey(0)
    k_x, k_p = jax.random.split(key)
    x = jax.random.normal(k_x, (BATCH, S_TASK_DIM + S_VM_DIM), jnp.float32)

    raw = make_raw_params(k_p, S_TASK_DIM, S_VM_DIM, A_DIM)
    fused = prepare_fused_params(raw, S_TASK_DIM, S_VM_DIM, A_DIM)

    out = dueling_dqn_forward(x, fused, A_DIM, block_batch=32)
    out = jax.block_until_ready(out)

    ref = reference_forward(x, raw, S_TASK_DIM)
    assert out.shape == (BATCH, A_DIM)
    max_err = float(jnp.max(jnp.abs(out - ref)))
    assert max_err < 5e-2, f"mismatch vs reference: max |err| = {max_err}"

    print("KERNEL_OK")
</pallas_src>

<mosaic_0001>
module attributes {stable_mosaic.version = 11 : i64} {
  func.func @_dueling_dqn_kernel(%arg0: i32, %arg1: memref<32x32xf32, #tpu.memory_space<vmem>>, %arg2: memref<32x96xbf16, #tpu.memory_space<vmem>>, %arg3: memref<1x96xbf16, #tpu.memory_space<vmem>>, %arg4: memref<96x32xbf16, #tpu.memory_space<vmem>>, %arg5: memref<1x32xbf16, #tpu.memory_space<vmem>>, %arg6: memref<96x32xbf16, #tpu.memory_space<vmem>>, %arg7: memref<32x32xbf16, #tpu.memory_space<vmem>>, %arg8: memref<1x32xbf16, #tpu.memory_space<vmem>>, %arg9: memref<32x128xbf16, #tpu.memory_space<vmem>>, %arg10: memref<1x128xf32, #tpu.memory_space<vmem>>, %arg11: memref<32x128xf32, #tpu.memory_space<vmem>>) attributes {dimension_semantics = [#tpu.dimension_semantics<parallel>], iteration_bounds = array<i64: 2>, scalar_prefetch = 0 : i64, scratch_operands = 0 : i64, tpu.core_type = #tpu.core_type<tc>, window_params = [{transform_indices = @transform_0, window_bounds = array<i64: 32, 32>}, {pipeline_mode = #tpu.pipeline_mode<synchronous>, transform_indices = @transform_1, window_bounds = array<i64: 32, 96>}, {pipeline_mode = #tpu.pipeline_mode<synchronous>, transform_indices = @transform_2, window_bounds = array<i64: 1, 96>}, {pipeline_mode = #tpu.pipeline_mode<synchronous>, transform_indices = @transform_3, window_bounds = array<i64: 96, 32>}, {pipeline_mode = #tpu.pipeline_mode<synchronous>, transform_indices = @transform_4, window_bounds = array<i64: 1, 32>}, {pipeline_mode = #tpu.pipeline_mode<synchronous>, transform_indices = @transform_5, window_bounds = array<i64: 96, 32>}, {pipeline_mode = #tpu.pipeline_mode<synchronous>, transform_indices = @transform_6, window_bounds = array<i64: 32, 32>}, {pipeline_mode = #tpu.pipeline_mode<synchronous>, transform_indices = @transform_7, window_bounds = array<i64: 1, 32>}, {pipeline_mode = #tpu.pipeline_mode<synchronous>, transform_indices = @transform_8, window_bounds = array<i64: 32, 128>}, {pipeline_mode = #tpu.pipeline_mode<synchronous>, transform_indices = @transform_9, window_bounds = array<i64: 1, 128>}, {transform_indices = @transform_10, window_bounds = array<i64: 32, 128>}]} {
    %c0 = arith.constant 0 : index
    %c0_0 = arith.constant 0 : index
    %0 = vector.load %arg1[%c0, %c0_0] : memref<32x32xf32, #tpu.memory_space<vmem>>, vector<32x32xf32>
    %1 = arith.truncf %0 : vector<32x32xf32> to vector<32x32xbf16>
    %c0_1 = arith.constant 0 : index
    %c0_2 = arith.constant 0 : index
    %2 = vector.load %arg2[%c0_1, %c0_2] : memref<32x96xbf16, #tpu.memory_space<vmem>>, vector<32x96xbf16>
    %cst = arith.constant dense<0.000000e+00> : vector<32x96xf32>
    %3 = tpu.matmul %1, %2, %cst {dimension_numbers = #tpu.dot_dimension_numbers<[1], [0], [0], [1], [0, 0, 1, 1], [], []>} : vector<32x32xbf16>, vector<32x96xbf16>, vector<32x96xf32> -> vector<32x96xf32>
    %4 = arith.truncf %3 : vector<32x96xf32> to vector<32x96xbf16>
    %c0_3 = arith.constant 0 : index
    %c0_4 = arith.constant 0 : index
    %5 = vector.load %arg3[%c0_3, %c0_4] : memref<1x96xbf16, #tpu.memory_space<vmem>>, vector<1x96xbf16>
    %6 = vector.broadcast %5 : vector<1x96xbf16> to vector<32x96xbf16>
    %7 = arith.addf %4, %6 : vector<32x96xbf16>
    %cst_5 = arith.constant 1.000980e-02 : bf16
    %8 = vector.broadcast %cst_5 : bf16 to vector<32x96xbf16>
    %9 = arith.mulf %8, %7 : vector<32x96xbf16>
    %10 = arith.maximumf %7, %9 : vector<32x96xbf16>
    %c0_6 = arith.constant 0 : index
    %c0_7 = arith.constant 0 : index
    %11 = vector.load %arg4[%c0_6, %c0_7] : memref<96x32xbf16, #tpu.memory_space<vmem>>, vector<96x32xbf16>
    %cst_8 = arith.constant dense<0.000000e+00> : vector<32x32xf32>
    %12 = tpu.matmul %10, %11, %cst_8 {dimension_numbers = #tpu.dot_dimension_numbers<[1], [0], [0], [1], [0, 0, 1, 1], [], []>} : vector<32x96xbf16>, vector<96x32xbf16>, vector<32x32xf32> -> vector<32x32xf32>
    %13 = arith.truncf %12 : vector<32x32xf32> to vector<32x32xbf16>
    %c0_9 = arith.constant 0 : index
    %c0_10 = arith.constant 0 : index
    %14 = vector.load %arg5[%c0_9, %c0_10] : memref<1x32xbf16, #tpu.memory_space<vmem>>, vector<1x32xbf16>
    %15 = vector.broadcast %14 : vector<1x32xbf16> to vector<32x32xbf16>
    %16 = arith.addf %13, %15 : vector<32x32xbf16>
    %cst_11 = arith.constant 1.000980e-02 : bf16
    %17 = vector.broadcast %cst_11 : bf16 to vector<32x32xbf16>
    %18 = arith.mulf %17, %16 : vector<32x32xbf16>
    %19 = arith.maximumf %16, %18 : vector<32x32xbf16>
    %c0_12 = arith.constant 0 : index
    %c0_13 = arith.constant 0 : index
    %20 = vector.load %arg6[%c0_12, %c0_13] : memref<96x32xbf16, #tpu.memory_space<vmem>>, vector<96x32xbf16>
    %cst_14 = arith.constant dense<0.000000e+00> : vector<32x32xf32>
    %21 = tpu.matmul %10, %20, %cst_14 {dimension_numbers = #tpu.dot_dimension_numbers<[1], [0], [0], [1], [0, 0, 1, 1], [], []>} : vector<32x96xbf16>, vector<96x32xbf16>, vector<32x32xf32> -> vector<32x32xf32>
    %c0_15 = arith.constant 0 : index
    %c0_16 = arith.constant 0 : index
    %22 = vector.load %arg7[%c0_15, %c0_16] : memref<32x32xbf16, #tpu.memory_space<vmem>>, vector<32x32xbf16>
    %cst_17 = arith.constant dense<0.000000e+00> : vector<32x32xf32>
    %23 = tpu.matmul %19, %22, %cst_17 {dimension_numbers = #tpu.dot_dimension_numbers<[1], [0], [0], [1], [0, 0, 1, 1], [], []>} : vector<32x32xbf16>, vector<32x32xbf16>, vector<32x32xf32> -> vector<32x32xf32>
    %24 = arith.addf %21, %23 : vector<32x32xf32>
    %25 = arith.truncf %24 : vector<32x32xf32> to vector<32x32xbf16>
    %c0_18 = arith.constant 0 : index
    %c0_19 = arith.constant 0 : index
    %26 = vector.load %arg8[%c0_18, %c0_19] : memref<1x32xbf16, #tpu.memory_space<vmem>>, vector<1x32xbf16>
    %27 = vector.broadcast %26 : vector<1x32xbf16> to vector<32x32xbf16>
    %28 = arith.addf %25, %27 : vector<32x32xbf16>
    %cst_20 = arith.constant 1.000980e-02 : bf16
    %29 = vector.broadcast %cst_20 : bf16 to vector<32x32xbf16>
    %30 = arith.mulf %29, %28 : vector<32x32xbf16>
    %31 = arith.maximumf %28, %30 : vector<32x32xbf16>
    %c0_21 = arith.constant 0 : index
    %c0_22 = arith.constant 0 : index
    %32 = vector.load %arg9[%c0_21, %c0_22] : memref<32x128xbf16, #tpu.memory_space<vmem>>, vector<32x128xbf16>
    %cst_23 = arith.constant dense<0.000000e+00> : vector<32x128xf32>
    %33 = tpu.matmul %31, %32, %cst_23 {dimension_numbers = #tpu.dot_dimension_numbers<[1], [0], [0], [1], [0, 0, 1, 1], [], []>} : vector<32x32xbf16>, vector<32x128xbf16>, vector<32x128xf32> -> vector<32x128xf32>
    %c0_24 = arith.constant 0 : index
    %c0_25 = arith.constant 0 : index
    %34 = vector.load %arg10[%c0_24, %c0_25] : memref<1x128xf32, #tpu.memory_space<vmem>>, vector<1x128xf32>
    %35 = vector.broadcast %34 : vector<1x128xf32> to vector<32x128xf32>
    %36 = arith.addf %33, %35 : vector<32x128xf32>
    %c0_26 = arith.constant 0 : index
    %c0_27 = arith.constant 0 : index
    %37 = vector.load %arg11[%c0_26, %c0_27] : memref<32x128xf32, #tpu.memory_space<vmem>>, vector<32x128xf32>
    tpu.vector_store %arg11[%c0_26, %c0_27], %36 {strides = array<i32>} : memref<32x128xf32, #tpu.memory_space<vmem>>, vector<32x128xf32>,
    return
  }
  func.func @transform_0(%arg0: i32) -> (i32, i32) {
    %c0_i32 = arith.constant 0 : i32
    %c0_i32_0 = arith.constant 0 : i32
    return %arg0, %c0_i32 : i32, i32
  }
  func.func @transform_1(%arg0: i32) -> (i32, i32) {
    %c0_i32 = arith.constant 0 : i32
    %c0_i32_0 = arith.constant 0 : i32
    %c0_i32_1 = arith.constant 0 : i32
    return %c0_i32, %c0_i32_0 : i32, i32
  }
  func.func @transform_2(%arg0: i32) -> (i32, i32) {
    %c0_i32 = arith.constant 0 : i32
    %c0_i32_0 = arith.constant 0 : i32
    %c0_i32_1 = arith.constant 0 : i32
    return %c0_i32, %c0_i32_0 : i32, i32
  }
  func.func @transform_3(%arg0: i32) -> (i32, i32) {
    %c0_i32 = arith.constant 0 : i32
    %c0_i32_0 = arith.constant 0 : i32
    %c0_i32_1 = arith.constant 0 : i32
    return %c0_i32, %c0_i32_0 : i32, i32
  }
  func.func @transform_4(%arg0: i32) -> (i32, i32) {
    %c0_i32 = arith.constant 0 : i32
    %c0_i32_0 = arith.constant 0 : i32
    %c0_i32_1 = arith.constant 0 : i32
    return %c0_i32, %c0_i32_0 : i32, i32
  }
  func.func @transform_5(%arg0: i32) -> (i32, i32) {
    %c0_i32 = arith.constant 0 : i32
    %c0_i32_0 = arith.constant 0 : i32
    %c0_i32_1 = arith.constant 0 : i32
    return %c0_i32, %c0_i32_0 : i32, i32
  }
  func.func @transform_6(%arg0: i32) -> (i32, i32) {
    %c0_i32 = arith.constant 0 : i32
    %c0_i32_0 = arith.constant 0 : i32
    %c0_i32_1 = arith.constant 0 : i32
    return %c0_i32, %c0_i32_0 : i32, i32
  }
  func.func @transform_7(%arg0: i32) -> (i32, i32) {
    %c0_i32 = arith.constant 0 : i32
    %c0_i32_0 = arith.constant 0 : i32
    %c0_i32_1 = arith.constant 0 : i32
    return %c0_i32, %c0_i32_0 : i32, i32
  }
  func.func @transform_8(%arg0: i32) -> (i32, i32) {
    %c0_i32 = arith.constant 0 : i32
    %c0_i32_0 = arith.constant 0 : i32
    %c0_i32_1 = arith.constant 0 : i32
    return %c0_i32, %c0_i32_0 : i32, i32
  }
  func.func @transform_9(%arg0: i32) -> (i32, i32) {
    %c0_i32 = arith.constant 0 : i32
    %c0_i32_0 = arith.constant 0 : i32
    %c0_i32_1 = arith.constant 0 : i32
    return %c0_i32, %c0_i32_0 : i32, i32
  }
  func.func @transform_10(%arg0: i32) -> (i32, i32) {
    %c0_i32 = arith.constant 0 : i32
    %c0_i32_0 = arith.constant 0 : i32
    return %arg0, %c0_i32 : i32, i32
  }
}

</mosaic_0001>

<bundles_post_ra>
// kernel: tpu_custom_call.1
= control target key start
LH: loop header
LB: loop body
LE: loop exit
PB: predicated region body
PF: predicated region fallthrough
CT: control target
= control target key end

     0   :  { %15 = vsyncpa [#allocation3], 0  ;;  %s1406_s0 = inlined_call_operand.vmem [shape: f32[64,32], index: 0, kind: input, shape index: {}]   ;;  %s1407_s1 = inlined_call_operand.vmem [shape: bf16[32,96], index: 1, kind: input, shape index: {}]   ;;  %s1408_s2 = inlined_call_operand.vmem [shape: bf16[1,96], index: 2, kind: input, shape index: {}]   ;;  %s1409_s3 = inlined_call_operand.vmem [shape: bf16[96,32], index: 3, kind: input, shape index: {}]   ;;  %s1410_s4 = inlined_call_operand.vmem [shape: bf16[1,32], index: 4, kind: input, shape index: {}]   ;;  %s1411_s5 = inlined_call_operand.vmem [shape: bf16[96,32], index: 5, kind: input, shape index: {}]   ;;  %s1412_s6 = inlined_call_operand.vmem [shape: bf16[32,32], index: 6, kind: input, shape index: {}]   ;;  %s1413_s7 = inlined_call_operand.vmem [shape: bf16[1,32], index: 7, kind: input, shape index: {}]   ;;  %s1414_s8 = inlined_call_operand.vmem [shape: bf16[32,128], index: 8, kind: input, shape index: {}]   ;;  %s1415_s9 = inlined_call_operand.vmem [shape: f32[1,128], index: 9, kind: input, shape index: {}]   ;;  %s1416_s10 = inlined_call_operand.hbm [shape: f32[64,128], index: 10, kind: output, shape index: {}]  }
   0x1   :  { %17 = vsyncpa [#allocation3 + $0x1], 0  ;;  %s1224_s13 = smov 0   ;;  %s1226_s14 = smov 0  }
   0x2   :  { %s1228_s15 = smov 0   ;;  %s1230_s16 = smov 0  }
   0x3 LB: > { %s1245_s17 = sadd.s32 4294967295, %s1164_s16   ;;  %s919_s18 = sadd.s32 4294967294, %s1164_s16   ;;  %s1164_s16 = sphi %s1230_s16, %s1422_s16   ;;  %s1160_s15 = sphi %s1228_s15, %s1421_s15   ;;  %s1156_s14 = sphi %s1226_s14, %s1420_s14   ;;  %s1152_s13 = sphi %s1224_s13, %s1419_s13  }
   0x4   : > { %s1249_s19 = sadd.s32 1, %s1164_s16   ;;  %s245_s20 = sadd.s32 1, %s1160_s15 }
   0x5   : > { %s242_s21 = ssub.s32 %s1164_s16, %s1249_s19  ;;  %p255_p0 = scmp.ne.s32.totalorder %s1160_s15, %s1156_s14 }
   0x6   : > { %p243_p1 = scmp.eq.s32.totalorder %s242_s21, 0  ;;  %p256_p2 = scmp.eq.s32.totalorder %s1245_s17, 1 }
   0x7   : > { %p261_p3 = scmp.ne.s32.totalorder %s1156_s14, %s1152_s13  ;;  %p262_p4 = scmp.eq.s32.totalorder %s919_s18, 1 }
   0x8   : > { %s1260_s22 = scalar_select %p243_p1, %s1160_s15, %s245_s20  }
   0x9   : > { %p1262_p5 = por %p256_p2, %p255_p0  ;;  %p1266_p6 = por %p262_p4, %p261_p3 }
   0xa   : > { %p922_p7 = scmp.ge.s32.totalorder %s1164_s16, 1  ;;  %p316_p8 = scmp.lt.s32.totalorder %s1164_s16, 3 }
   0xc   : > { %p317_p9 = pnand %p922_p7, %p316_p8 }
   0xd   : > { %s924_s27 = sshll.u32 (!%p317_p9), %s1245_s17, 2  ;;  %s351_s28 = sand.u32 (!%p317_p9), 1, %s1156_s14  }
   0xe   : > { %320 = sbr.rel (%p317_p9) target bundleno = 893 (0x37d), region = 60  ;;  %p355_p10 = scmp.lt.s32.totalorder (!%p317_p9), %s924_s27, 7 }
   0xf   : > { %s923_s29 = sshll.u32 (!%p317_p9), %s351_s28, 5 }
  0x10   : > { %s353_s12 = scalar_lea.vmem (!%p317_p9), [#allocation2], %s923_s29  ;;  %s1166_s29 = smov (!%p317_p9), [#allocation2]  }
  0x11   : > { %s857_s18 = sshll.u32 (!%p317_p9), %s353_s12, 4  ;;  %s1108_s30 = sshll.u32 (!%p317_p9), %s1166_s29, 4  ;;  %s1359_s18 = int_to_ptr.vmem [resolvable:$true] %s857_s18  ;;  %s1109_s30 = int_to_ptr.vmem [resolvable:$false] %s1108_s30 }
  0x12   : > { %s1110_s11 = scalar_lea.vmem (!%p317_p9), %s1109_s30, 1024  ;;  %p1111_p0 = scmp.lt.s32.totalorder (!%p317_p9), %s1359_s18, %s1109_s30 }
  0x13   : > { %v1086_v0 = vld [vmem:[%s1407_s1 + $0x8] sm:$0xff]   ;;  %v1087_v1 = vld [vmem:[%s1407_s1] sm:$0xff]   ;;  %s1424_s27 = smov (!%p355_p10, %s924_s27), 7  ;;  %vm385_vm0 = vcmask 261120   ;;  %v1090_v10 = vld [vmem:[%s1409_s3 + $0x18] sm:$0xff]   ;;  %v447_v14 = vlaneseq  ;;  %vm505_vm1 = vcmask 785408  }
  0x14   : > { %989 = vmatprep.subr.bf16.mxu0 %v1086_v0  ;;  %v1088_v2 = vld [vmem:[%s1409_s3 + $0x28] sm:$0xff]   ;;  %v1089_v3 = vld [vmem:[%s1409_s3 + $0x20] sm:$0xff]   ;;  %s925_s20 = sshll.u32 %s1424_s27, 3  ;;  %v1091_v11 = vld [vmem:[%s1409_s3 + $0x10] sm:$0xff]   ;;  %s1366_s27 = scalar_lea.sflag [#allocation3], %s351_s28 }
  0x15   : > { %990 = vmatpush3.bf16.msra.mxu0 %v1086_v0  ;;  %997 = vmatprep.subr.bf16.mxu1 %v1088_v2  ;;  %s358_s26 = scalar_lea.vmem %s1406_s0, %s925_s20  ;;  %v1092_v12 = vld [vmem:[%s1409_s3 + $0x8] sm:$0xff]   ;;  %v1093_v13 = vld [vmem:[%s1409_s3] sm:$0xff]   ;;  %v448_v15 = vshrl.u32 %v447_v14, 7  ;;  %v1098_v51 = vld [vmem:[%s1411_s5 + $0x18] sm:$0xff]   ;;  %s960_s20 = sshll.u32 %s1245_s17, 9 }
  0x16   : > { %991 = vmatprep.subr.bf16.mxu0 %v1087_v1  ;;  %998 = vmatpush3.bf16.msra.mxu1 %v1088_v2  ;;  %v363_v4 = vld [vmem:[%s358_s26] sm:$0xff]  ;;  %v364_v5 = vld [vmem:[%s358_s26 + $0x8] sm:$0xff]  ;;  %v365_v6 = vld [vmem:[%s358_s26 + $0x10] sm:$0xff]  ;;  %s1104_s17 = scalar_lea.vmem %s1359_s18, 512 }
  0x17   : > { %999 = vmatprep.subr.bf16.mxu1 %v1089_v3  ;;  %v367_v7 = vpack.c.bf16 %v364_v5, %v363_v4  ;;  %v366_v8 = vld [vmem:[%s358_s26 + $0x18] sm:$0xff]  ;;  %v443_v16 = vld [vmem:[%s1408_s2] sm:$0x1]  ;;  %v1305_v18 = vsub.s32 0, %v448_v15  ;;  %v1094_v32 = vld [vmem:[%s1412_s6 + $0x8] sm:$0xff]   ;;  %s1364_s26 = scalar_lea.hbm %s1416_s10, %s960_s20  ;;  %p1105_p11 = scmp.ne.s32.totalorder %s1359_s18, %s1104_s17 }
  0x18   : > { %v368_v9 = vpack.c.bf16 %v366_v8, %v365_v6  ;;  %v445_v17 = vpack.i.b16 %v443_v16, %v443_v16  ;;  %v1095_v33 = vld [vmem:[%s1412_s6] sm:$0xff]   ;;  %v1096_v34 = vld [vmem:[%s1411_s5 + $0x28] sm:$0xff]   ;;  %v1099_v52 = vld [vmem:[%s1411_s5 + $0x10] sm:$0xff]   ;;  %p1112_p1 = scmp.lt.s32.totalorder %s1110_s11, %s1104_s17 }
  0x19   : > { %992 = vmatpush3.bf16.msra.mxu0 %v1087_v1  ;;  %993 = vmatprep.mubr.msk.bf16.mxu0 %vm385_vm0, %v367_v7  ;;  %v563_v35 = vld [vmem:[%s1410_s4] sm:$0x1]  ;;  %v1100_v53 = vld [vmem:[%s1411_s5 + $0x8] sm:$0xff]   ;;  %p1106_p12 = pnand %p1105_p11, %p1262_p5 }
  0x1a   : > { %1000 = vmatpush3.bf16.msra.mxu1 %v1089_v3  ;;  %v450_v21 = vrot.slane %v445_v17, %v1305_v18  ;;  %1013 = vmatprep.subr.bf16.mxu0 %v1094_v32  ;;  %v565_v36 = vpack.i.b16 %v563_v35, %v563_v35  ;;  %v1097_v50 = vld [vmem:[%s1411_s5 + $0x20] sm:$0xff]   ;;  %v1102_v55 = vld [vmem:[%s1414_s8 + $0x8] sm:$0xff]   ;;  %p1113_p2 = por %p1112_p1, %p1111_p0 }
  0x1b   : > { %1001 = vmatprep.subr.bf16.mxu1 %v1090_v10  ;;  %v1101_v54 = vld [vmem:[%s1411_s5] sm:$0xff]   ;;  %p1107_p13 = pneg %p1106_p12 }
  0x1c   : > { %994 = vmatmul.mubr.msk.bf16.vlgmr.msra.gmra.mxu0 %vm385_vm0, %v368_v9  ;;  %v570_v39 = vrot.slane %v565_v36, %v1305_v18  ;;  %v1103_v56 = vld [vmem:[%s1414_s8] sm:$0xff]  }
  0x1d   : > { %1014 = vmatpush3.bf16.msra.mxu0 %v1094_v32  ;;  %v747_v61 = vld [vmem:[%s1413_s7] sm:$0x1]  ;;  %p1114_p3 = pnand %p1113_p2, %p1107_p13 }
  0x1e   : > { %1002 = vmatpush3.bf16.msra.mxu1 %v1090_v10  ;;  %1015 = vmatprep.subr.bf16.mxu0 %v1095_v33  ;;  %v749_v63 = vpack.i.b16 %v747_v61, %v747_v61  ;;  %v950_v16 = vld [vmem:[%s1415_s9] ss:$0 sm:$0xff] }
  0x1f   : > { %1003 = vmatprep.subr.bf16.mxu1 %v1091_v11 }
  0x20   : > { %v754_v4 = vrot.slane %v749_v63, %v1305_v18 }
  0x21   : > { %1016 = vmatpush3.bf16.msra.mxu0 %v1095_v33 }
  0x22   : > { %1004 = vmatpush3.bf16.msra.mxu1 %v1091_v11  ;;  %1021 = vmatprep.subr.bf16.mxu0 %v1096_v34 }
  0x23   : > { %1005 = vmatprep.subr.bf16.mxu1 %v1092_v12 }
  0x26   : > { %1006 = vmatpush3.bf16.msra.mxu1 %v1092_v12 }
  0x27   : > { %1007 = vmatprep.subr.bf16.mxu1 %v1093_v13 }
  0x2a   : > { %1008 = vmatpush3.bf16.msra.mxu1 %v1093_v13 }
  0x2b   : > { %1037 = vmatprep.subr.bf16.mxu1 %v1102_v55 }
  0xdc   : > { %v995_v19 = vpop.f32.mrf.mxu0 }
  0xde   : > { %v426_v20 = vpop.f32.mrf.mxu0 }
  0xe0   : > { %v996_v22 = vpop.f32.mrf.mxu0 }
  0xe1   : > { %v442_v23 = vpack.c.bf16 %v996_v22, %v995_v19 }
  0xe2   : > { %v429_v24 = vpop.f32.mrf.mxu0 }
  0xe3   : > { %v452_v25 = vadd.bf16 %v450_v21, %v442_v23  ;;  %v441_v26 = vpack.c.bf16 %v429_v24, %v426_v20 }
  0xe5   : > { %v451_v27 = vadd.bf16 %v450_v21, %v441_v26  ;;  %v454_v28 = vmul.bf16 1009007652, %v452_v25 }
  0xe7   : > { %v453_v29 = vmul.bf16 1009007652, %v451_v27  ;;  %v456_v31 = vmax.bf16 %v454_v28, %v452_v25 }
  0xe9   : > { %v455_v30 = vmax.bf16 %v453_v29, %v451_v27 }
  0xeb   : > { %1009 = vmatprep.mubr.msk.bf16.mxu1 %vm505_vm1, %v455_v30 }
  0xec   : > { %1010 = vmatmul.mubr.msk.bf16.vlgmr.msra.gmra.mxu1 %vm505_vm1, %v456_v31 }
  0xed   : > { %1038 = vmatpush3.bf16.msra.mxu1 %v1102_v55 }
  0xee   : > { %1039 = vmatprep.subr.bf16.mxu1 %v1103_v56 }
  0xf1   : > { %1040 = vmatpush3.bf16.msra.mxu1 %v1103_v56 }
 0x1ac   : > { %v1011_v37 = vpop.f32.mrf.mxu1 }
 0x1ae   : > { %v546_v38 = vpop.f32.mrf.mxu1 }
 0x1b0   : > { %v1012_v40 = vpop.f32.mrf.mxu1 }
 0x1b1   : > { %v562_v41 = vpack.c.bf16 %v1012_v40, %v1011_v37 }
 0x1b2   : > { %v549_v42 = vpop.f32.mrf.mxu1 }
 0x1b3   : > { %v572_v43 = vadd.bf16 %v570_v39, %v562_v41  ;;  %v561_v44 = vpack.c.bf16 %v549_v42, %v546_v38 }
 0x1b5   : > { %v571_v45 = vadd.bf16 %v570_v39, %v561_v44  ;;  %v574_v46 = vmul.bf16 1009007652, %v572_v43 }
 0x1b7   : > { %v573_v47 = vmul.bf16 1009007652, %v571_v45  ;;  %v576_v49 = vmax.bf16 %v574_v46, %v572_v43 }
 0x1b9   : > { %v575_v48 = vmax.bf16 %v573_v47, %v571_v45 }
 0x1bb   : > { %1017 = vmatprep.mubr.msk.bf16.mxu0 %vm385_vm0, %v575_v48 }
 0x1bc   : > { %1018 = vmatmul.mubr.msk.bf16.vlgmr.msra.gmra.mxu0 %vm385_vm0, %v576_v49 }
 0x1bd   : > { %1022 = vmatpush3.bf16.msra.mxu0 %v1096_v34  ;;  %1033 = vmatprep.mubr.msk.bf16.mxu0 %vm505_vm1, %v455_v30 }
 0x1be   : > { %1023 = vmatprep.subr.bf16.mxu0 %v1097_v50 }
 0x1c1   : > { %1024 = vmatpush3.bf16.msra.mxu0 %v1097_v50 }
 0x1c2   : > { %1025 = vmatprep.subr.bf16.mxu0 %v1098_v51 }
 0x1c5   : > { %1026 = vmatpush3.bf16.msra.mxu0 %v1098_v51 }
 0x1c6   : > { %1027 = vmatprep.subr.bf16.mxu0 %v1099_v52 }
 0x1c9   : > { %1028 = vmatpush3.bf16.msra.mxu0 %v1099_v52 }
 0x1ca   : > { %1029 = vmatprep.subr.bf16.mxu0 %v1100_v53 }
 0x1cd   : > { %1030 = vmatpush3.bf16.msra.mxu0 %v1100_v53 }
 0x1ce   : > { %1031 = vmatprep.subr.bf16.mxu0 %v1101_v54 }
 0x1d1   : > { %1032 = vmatpush3.bf16.msra.mxu0 %v1101_v54 }
 0x1d4   : > { %1034 = vmatmul.mubr.msk.bf16.vlgmr.msra.gmra.mxu0 %vm505_vm1, %v456_v31 }
 0x27c   : > { %v1019_v57 = vpop.f32.mrf.mxu0 }
 0x27e   : > { %v645_v58 = vpop.f32.mrf.mxu0 }
 0x280   : > { %v1020_v59 = vpop.f32.mrf.mxu0 }
 0x282   : > { %v648_v60 = vpop.f32.mrf.mxu0 }
 0x294   : > { %v1035_v62 = vpop.f32.mrf.mxu0 }
 0x295   : > { %v739_v2 = vadd.f32 %v1035_v62, %v1019_v57 }
 0x296   : > { %v730_v0 = vpop.f32.mrf.mxu0 }
 0x297   : > { %v731_v6 = vadd.f32 %v730_v0, %v645_v58 }
 0x298   : > { %v1036_v1 = vpop.f32.mrf.mxu0 }
 0x299   : > { %v742_v3 = vadd.f32 %v1036_v1, %v1020_v59 }
 0x29a   : > { %v733_v5 = vpop.f32.mrf.mxu0 }
 0x29b   : > { %v746_v7 = vpack.c.bf16 %v742_v3, %v739_v2  ;;  %v734_v8 = vadd.f32 %v733_v5, %v648_v60 }
 0x29d   : > { %v756_v9 = vadd.bf16 %v754_v4, %v746_v7  ;;  %v745_v10 = vpack.c.bf16 %v734_v8, %v731_v6 }
 0x29f   : > { %v755_v11 = vadd.bf16 %v754_v4, %v745_v10  ;;  %v758_v12 = vmul.bf16 1009007652, %v756_v9 }
 0x2a1   : > { %v757_v13 = vmul.bf16 1009007652, %v755_v11  ;;  %v760_v15 = vmax.bf16 %v758_v12, %v756_v9 }
 0x2a3   : > { %v759_v14 = vmax.bf16 %v757_v13, %v755_v11 }
 0x2a5   : > { %1041 = vmatprep.mubr.msk.bf16.mxu1 %vm385_vm0, %v759_v14 }
 0x2a6   : > { %1042 = vmatmul.mubr.msk.bf16.vlgmr.msra.gmra.mxu1 %vm385_vm0, %v760_v15 }
 0x366   : > { %v1043_v17 = vpop.f32.mrf.mxu1 }
 0x367   : > { %v833_v18 = vadd.f32 %v1043_v17, %v950_v16 }
 0x368   : > { %v824_v19 = vpop.f32.mrf.mxu1 }
 0x369   : > { %841 = vst [vmem:[%s353_s12 + $0x10] sm:$0xff] %v833_v18  ;;  %v825_v20 = vadd.f32 %v950_v16, %v824_v19 }
 0x36a   : > { %v1044_v21 = vpop.f32.mrf.mxu1 }
 0x36b   : > { %839 = vst [vmem:[%s353_s12] sm:$0xff] %v825_v20  ;;  %v836_v22 = vadd.f32 %v1044_v21, %v950_v16 }
 0x36c   : > { %v827_v23 = vpop.f32.mrf.mxu1 }
 0x36d   : > { %842 = vst [vmem:[%s353_s12 + $0x18] sm:$0xff] %v836_v22  ;;  %v828_v24 = vadd.f32 %v950_v16, %v827_v23 }
 0x36f   : > { %840 = vst [vmem:[%s353_s12 + $0x8] sm:$0xff] %v828_v24 }
 0x370   : > { %1117 = shalt.err (!%p1114_p3)
}
 0x371   : > { %s1118_s28 = scalar_lea.hbm %s1364_s26, 512  ;;  %s1122_s21 = scalar_lea.hbm %s1416_s10, 1024 }
 0x372   : > { %p1119_p4 = scmp.ne.s32.totalorder %s1364_s26, %s1118_s28  ;;  %p1123_p9 = scmp.lt.s32.totalorder %s1364_s26, %s1416_s10 }
 0x373   : > { %p1124_p10 = scmp.lt.s32.totalorder %s1122_s21, %s1118_s28 }
 0x374   : > { %p1120_p7 = pnand %p1119_p4, %p1262_p5 }
 0x375   : > { %p1125_p11 = por %p1124_p10, %p1123_p9 }
 0x376   : > { %p1121_p8 = pneg %p1120_p7 }
 0x378   : > { %p1126_p12 = pnand %p1125_p11, %p1121_p8 }
 0x37a   : > { %1129 = shalt.err (!%p1126_p12)
}
 0x37b   : > { %s1167_s17 = smov 128   ;;  %s1168_s30 = smov 8  }
 0x37c   : > { %1045 = dma.vmem_to_hbm [thread:$0]  (%p1262_p5), %s1359_s18, 512, %s1364_s26, %s1366_s27, %s1167_s17, %s1167_s17, %s1168_s30  }
 0x37d PF: > { %p1051_p13 = scmp.ge.s32.totalorder %s1164_s16, 2  ;;  %s872_s11 = sand.u32 1, %s1152_s13  }
 0x37e   : > { %s873_s28 = scalar_lea.sflag [#allocation3], %s872_s11 }
 0x37f   : > { %p1048_p0 = pnand %p1051_p13, %p1266_p6 }
 0x381   : > { %p1049_p1 = pneg %p1048_p0 }
 0x383   : > { %1147 = dma.done.wait (%p1049_p1), %s873_s28, 512  }
 0x384   : > { %1149 = vsyncadd (%p1049_p1), %s873_s28, 4294966784  ;;  %p20_p2 = scmp.ge.s32.totalorder %s1249_s19, 4   ;;  %s1419_s13 = smov %s1156_s14 }
 0x385   : > { %s1420_s14 = smov %s1160_s15  ;;  %s1421_s15 = smov %s1260_s22 }
 0x386   : > { %s1422_s16 = smov %s1249_s19  ;;  %22 = sbr.rel (!%p20_p2) target bundleno = 3 (0x3), region = 95 }
 0x38b   :  { %878 = vsyncpa [#allocation3], 1 }
 0x38c   :  { %880 = vsyncpa [#allocation3 + $0x1], 1 }

</bundles_post_ra>
